<compile_context>
chip_gen: v6e
topology: v6e:2x2x1
jax: 0.10.0
libtpu: 0.0.40
codegen_flags: <defaults>
</compile_context>

<pallas_src>
import functools
import math

import jax
import jax.numpy as jnp
from jax import lax
from jax.experimental import pallas as pl
from jax.experimental.pallas import tpu as pltpu


# ----------------------------------------------------------------------------
# Fused kernel: ONE invocation, batch folded into the sublane axis.
# ----------------------------------------------------------------------------
def _fused_mha_kernel(
    q_ref, k_ref, v_ref, w_ref, bm_ref, o_ref, ctx_ref,
    *, B, NQ, NK, D, n_heads, d_k, scale,
):
    # q_ref: (B*NQ, D); k_ref/v_ref: (B*NK, D)
    # w_ref: (4*D, D) stacked [Wq; Wk; Wv; Wo]
    # bm_ref: (8, C) rows 0..3 = bq, bk, bv, bo (first D cols),
    #                 row 4 = additive key-mask bias (first NK cols, 0 / -1e9)
    # ctx_ref: (B*NQ, D) VMEM scratch for the merged head contexts.
    wq = w_ref[0 * D:1 * D, :]
    wk = w_ref[1 * D:2 * D, :]
    wv = w_ref[2 * D:3 * D, :]
    wo = w_ref[3 * D:4 * D, :]
    bq = bm_ref[0:1, 0:D]
    bk = bm_ref[1:2, 0:D]
    bv = bm_ref[2:3, 0:D]
    bo = bm_ref[3:4, 0:D]
    mbias = bm_ref[4:5, 0:NK]                     # (1, NK), broadcasts over nq

    # Batched projections: one (B*NQ, D) @ (D, D) matmul each.
    # 1/sqrt(d_k) folded into q once.
    qp = (jnp.dot(q_ref[...], wq, preferred_element_type=jnp.float32) + bq) * scale
    kp = jnp.dot(k_ref[...], wk, preferred_element_type=jnp.float32) + bk
    vp = jnp.dot(v_ref[...], wv, preferred_element_type=jnp.float32) + bv

    # Per-(head, batch) attention; every head context is written into ctx_ref
    # so the output projection becomes a single matmul afterwards.
    for h in range(n_heads):
        lo = h * d_k
        qh = qp[:, lo:lo + d_k]                   # (B*NQ, dk) one lane slice / head
        kh = kp[:, lo:lo + d_k]                   # (B*NK, dk)
        vh = vp[:, lo:lo + d_k]                   # (B*NK, dk)
        for b in range(B):
            qb = qh[b * NQ:(b + 1) * NQ, :]       # sublane slices
            kb = kh[b * NK:(b + 1) * NK, :]
            vb = vh[b * NK:(b + 1) * NK, :]

            # scores = (q/sqrt(dk)) @ k^T + mask_bias   -> (NQ, NK)
            s = lax.dot_general(
                qb, kb, (((1,), (1,)), ((), ())),
                preferred_element_type=jnp.float32,
            ) + mbias

            # numerically stable softmax over keys (exact divide)
            s = s - jnp.max(s, axis=-1, keepdims=True)
            e = jnp.exp(s)
            p = e / jnp.sum(e, axis=-1, keepdims=True)

            ctx_ref[b * NQ:(b + 1) * NQ, lo:lo + d_k] = jnp.dot(
                p, vb, preferred_element_type=jnp.float32)

    # Single output projection for all batches & heads + single full store.
    out = jnp.dot(ctx_ref[...], wo, preferred_element_type=jnp.float32) + bo
    o_ref[...] = out.astype(o_ref.dtype)


# ----------------------------------------------------------------------------
# Wrapper
# ----------------------------------------------------------------------------
def mask_half_attention(q, k, v, params, key_mask, n_heads):
    """Full forward pass of MaskHalfAttention.

    q: (B, nq, d_model); k, v: (B, nk, d_model)
    key_mask: (1, nk) bool/float (nonzero == masked).
    """
    B, NQ, D = q.shape
    NK = k.shape[1]
    assert D % n_heads == 0
    d_k = D // n_heads
    scale = 1.0 / math.sqrt(d_k)

    # --- stack parameters into 2 inputs (fewer DMA streams) -----------------
    w_stack = jnp.concatenate(
        [params["wq"], params["wk"], params["wv"], params["wo"]], axis=0
    )                                                         # (4*D, D)
    C = max(D, NK)
    bm = jnp.zeros((8, C), jnp.float32)
    bm = bm.at[0, :D].set(params["bq"].reshape(D))
    bm = bm.at[1, :D].set(params["bk"].reshape(D))
    bm = bm.at[2, :D].set(params["bv"].reshape(D))
    bm = bm.at[3, :D].set(params["bo"].reshape(D))
    # Fold the random key mask into an additive bias row (0 or -1e9).
    mbias = jnp.where(key_mask.reshape(NK) > 0.5,
                      jnp.float32(-1e9), jnp.float32(0.0))
    bm = bm.at[4, :NK].set(mbias)

    # --- fold batch into the sublane axis (free, contiguous reshapes) -------
    q2 = q.reshape(B * NQ, D)
    k2 = k.reshape(B * NK, D)
    v2 = v.reshape(B * NK, D)

    kernel = functools.partial(
        _fused_mha_kernel, B=B, NQ=NQ, NK=NK, D=D,
        n_heads=n_heads, d_k=d_k, scale=scale,
    )

    # Advisory cost estimate for XLA scheduling of the fused call.
    flops = (
        2 * (B * NQ) * D * D          # q projection
        + 2 * 2 * (B * NK) * D * D    # k, v projections
        + 4 * B * NQ * NK * D         # scores + p@v over all heads
        + 2 * (B * NQ) * D * D        # output projection
    )
    transcendentals = B * n_heads * NQ * NK       # exp
    bytes_accessed = 4 * (
        2 * B * NQ * D + 2 * B * NK * D           # q, out, k, v
        + 4 * D * D + 8 * C                       # stacked weights + biases/mask
    )

    out2 = pl.pallas_call(
        kernel,
        out_shape=jax.ShapeDtypeStruct((B * NQ, D), jnp.float32),
        grid=(1,),                                  # single step: overhead-bound kernel
        in_specs=[
            pl.BlockSpec((B * NQ, D), lambda i: (0, 0)),   # q (batch-folded)
            pl.BlockSpec((B * NK, D), lambda i: (0, 0)),   # k
            pl.BlockSpec((B * NK, D), lambda i: (0, 0)),   # v
            pl.BlockSpec((4 * D, D), lambda i: (0, 0)),    # stacked weights
            pl.BlockSpec((8, C), lambda i: (0, 0)),        # biases + mask bias
        ],
        out_specs=pl.BlockSpec((B * NQ, D), lambda i: (0, 0)),
        scratch_shapes=[pltpu.VMEM((B * NQ, D), jnp.float32)],   # merged head ctx
        compiler_params=pltpu.CompilerParams(
            dimension_semantics=("arbitrary",)),
        cost_estimate=pl.CostEstimate(
            flops=flops,
            transcendentals=transcendentals,
            bytes_accessed=bytes_accessed,
        ),
    )(q2, k2, v2, w_stack, bm)

    return out2.reshape(B, NQ, D)


# ----------------------------------------------------------------------------
# Deterministic parameter init (xavier_uniform weights, zero bias)
# ----------------------------------------------------------------------------
def init_params(key, d_model):
    limit = math.sqrt(6.0 / (d_model + d_model))
    ks = jax.random.split(key, 4)
    params = {}
    for name, kk in zip(("q", "k", "v", "o"), ks):
        # stored as (d_in, d_out) so forward is x @ W + b
        params[f"w{name}"] = jax.random.uniform(
            kk, (d_model, d_model), jnp.float32, -limit, limit
        )
        params[f"b{name}"] = jnp.zeros((1, d_model), jnp.float32)
    return params


# ----------------------------------------------------------------------------
# Pure-JAX reference (same semantics as the PyTorch module, eval mode)
# ----------------------------------------------------------------------------
def _reference(q, k, v, params, key_mask, n_heads):
    B, NQ, D = q.shape
    NK = k.shape[1]
    d_k = D // n_heads
    hp = jax.lax.Precision.HIGHEST
    qp = jnp.matmul(q, params["wq"], precision=hp) + params["bq"]
    kp = jnp.matmul(k, params["wk"], precision=hp) + params["bk"]
    vp = jnp.matmul(v, params["wv"], precision=hp) + params["bv"]
    qh = qp.reshape(B, NQ, n_heads, d_k).transpose(0, 2, 1, 3)
    kh = kp.reshape(B, NK, n_heads, d_k).transpose(0, 2, 1, 3)
    vh = vp.reshape(B, NK, n_heads, d_k).transpose(0, 2, 1, 3)
    s = jnp.einsum("bhqd,bhkd->bhqk", qh, kh, precision=hp) / math.sqrt(d_k)
    s = jnp.where(key_mask.reshape(1, 1, 1, NK) > 0.5, jnp.float32(-1e9), s)
    p = jax.nn.softmax(s, axis=-1)
    o = jnp.einsum("bhqk,bhkd->bhqd", p, vh, precision=hp)
    o = o.transpose(0, 2, 1, 3).reshape(B, NQ, D)
    return jnp.matmul(o, params["wo"], precision=hp) + params["bo"]


if __name__ == "__main__":
    d_model = 32
    n_heads = 4
    B, NQ, NK = 2, 8, 8

    root = jax.random.PRNGKey(0)
    k_params, k_q, k_k, k_v, k_mask = jax.random.split(root, 5)

    params = init_params(k_params, d_model)
    q = jax.random.normal(k_q, (B, NQ, d_model), jnp.float32)
    k = jax.random.normal(k_k, (B, NK, d_model), jnp.float32)
    v = jax.random.normal(k_v, (B, NK, d_model), jnp.float32)

    # random key-column mask: rand(nk) > 0.9 (True == masked), kept deterministic
    key_mask = (jax.random.uniform(k_mask, (1, NK)) > 0.9).astype(jnp.float32)

    out = mask_half_attention(q, k, v, params, key_mask, n_heads)
    jax.block_until_ready(out)
    assert out.shape == (B, NQ, d_model)

    ref = _reference(q, k, v, params, key_mask, n_heads)
    assert jnp.allclose(out, ref, atol=2e-3, rtol=2e-3)

    print("KERNEL_OK")
</pallas_src>

<mosaic_0001>
module attributes {stable_mosaic.version = 11 : i64} {
  func.func @_fused_mha_kernel(%arg0: i32, %arg1: memref<16x32xf32, #tpu.memory_space<vmem>>, %arg2: memref<16x32xf32, #tpu.memory_space<vmem>>, %arg3: memref<16x32xf32, #tpu.memory_space<vmem>>, %arg4: memref<128x32xf32, #tpu.memory_space<vmem>>, %arg5: memref<8x32xf32, #tpu.memory_space<vmem>>, %arg6: memref<16x32xf32, #tpu.memory_space<vmem>>, %arg7: memref<16x32xf32, #tpu.memory_space<vmem>>) attributes {dimension_semantics = [#tpu.dimension_semantics<arbitrary>], iteration_bounds = array<i64: 1>, scalar_prefetch = 0 : i64, scratch_operands = 1 : i64, tpu.core_type = #tpu.core_type<tc>, window_params = [{pipeline_mode = #tpu.pipeline_mode<synchronous>, transform_indices = @transform_0, window_bounds = array<i64: 16, 32>}, {pipeline_mode = #tpu.pipeline_mode<synchronous>, transform_indices = @transform_1, window_bounds = array<i64: 16, 32>}, {pipeline_mode = #tpu.pipeline_mode<synchronous>, transform_indices = @transform_2, window_bounds = array<i64: 16, 32>}, {pipeline_mode = #tpu.pipeline_mode<synchronous>, transform_indices = @transform_3, window_bounds = array<i64: 128, 32>}, {pipeline_mode = #tpu.pipeline_mode<synchronous>, transform_indices = @transform_4, window_bounds = array<i64: 8, 32>}, {pipeline_mode = #tpu.pipeline_mode<synchronous>, transform_indices = @transform_5, window_bounds = array<i64: 16, 32>}]} {
    %c0 = arith.constant 0 : index
    %c0_0 = arith.constant 0 : index
    %0 = vector.load %arg4[%c0, %c0_0] : memref<128x32xf32, #tpu.memory_space<vmem>>, vector<32x32xf32>
    %c32 = arith.constant 32 : index
    %c0_1 = arith.constant 0 : index
    %1 = vector.load %arg4[%c32, %c0_1] : memref<128x32xf32, #tpu.memory_space<vmem>>, vector<32x32xf32>
    %c64 = arith.constant 64 : index
    %c0_2 = arith.constant 0 : index
    %2 = vector.load %arg4[%c64, %c0_2] : memref<128x32xf32, #tpu.memory_space<vmem>>, vector<32x32xf32>
    %c96 = arith.constant 96 : index
    %c0_3 = arith.constant 0 : index
    %3 = vector.load %arg4[%c96, %c0_3] : memref<128x32xf32, #tpu.memory_space<vmem>>, vector<32x32xf32>
    %c0_4 = arith.constant 0 : index
    %c0_5 = arith.constant 0 : index
    %4 = vector.load %arg5[%c0_4, %c0_5] : memref<8x32xf32, #tpu.memory_space<vmem>>, vector<1x32xf32>
    %c1 = arith.constant 1 : index
    %c0_6 = arith.constant 0 : index
    %5 = vector.load %arg5[%c1, %c0_6] : memref<8x32xf32, #tpu.memory_space<vmem>>, vector<1x32xf32>
    %c2 = arith.constant 2 : index
    %c0_7 = arith.constant 0 : index
    %6 = vector.load %arg5[%c2, %c0_7] : memref<8x32xf32, #tpu.memory_space<vmem>>, vector<1x32xf32>
    %c3 = arith.constant 3 : index
    %c0_8 = arith.constant 0 : index
    %7 = vector.load %arg5[%c3, %c0_8] : memref<8x32xf32, #tpu.memory_space<vmem>>, vector<1x32xf32>
    %c4 = arith.constant 4 : index
    %c0_9 = arith.constant 0 : index
    %8 = vector.load %arg5[%c4, %c0_9] : memref<8x32xf32, #tpu.memory_space<vmem>>, vector<1x8xf32>
    %c0_10 = arith.constant 0 : index
    %c0_11 = arith.constant 0 : index
    %9 = vector.load %arg1[%c0_10, %c0_11] : memref<16x32xf32, #tpu.memory_space<vmem>>, vector<16x32xf32>
    %cst = arith.constant dense<0.000000e+00> : vector<16x32xf32>
    %10 = tpu.matmul %9, %0, %cst {dimension_numbers = #tpu.dot_dimension_numbers<[1], [0], [0], [1], [0, 0, 1, 1], [], []>} : vector<16x32xf32>, vector<32x32xf32>, vector<16x32xf32> -> vector<16x32xf32>
    %11 = vector.broadcast %4 : vector<1x32xf32> to vector<16x32xf32>
    %12 = arith.addf %10, %11 : vector<16x32xf32>
    %cst_12 = arith.constant 0.353553385 : f32
    %13 = vector.broadcast %cst_12 : f32 to vector<16x32xf32>
    %14 = arith.mulf %12, %13 : vector<16x32xf32>
    %c0_13 = arith.constant 0 : index
    %c0_14 = arith.constant 0 : index
    %15 = vector.load %arg2[%c0_13, %c0_14] : memref<16x32xf32, #tpu.memory_space<vmem>>, vector<16x32xf32>
    %cst_15 = arith.constant dense<0.000000e+00> : vector<16x32xf32>
    %16 = tpu.matmul %15, %1, %cst_15 {dimension_numbers = #tpu.dot_dimension_numbers<[1], [0], [0], [1], [0, 0, 1, 1], [], []>} : vector<16x32xf32>, vector<32x32xf32>, vector<16x32xf32> -> vector<16x32xf32>
    %17 = vector.broadcast %5 : vector<1x32xf32> to vector<16x32xf32>
    %18 = arith.addf %16, %17 : vector<16x32xf32>
    %c0_16 = arith.constant 0 : index
    %c0_17 = arith.constant 0 : index
    %19 = vector.load %arg3[%c0_16, %c0_17] : memref<16x32xf32, #tpu.memory_space<vmem>>, vector<16x32xf32>
    %cst_18 = arith.constant dense<0.000000e+00> : vector<16x32xf32>
    %20 = tpu.matmul %19, %2, %cst_18 {dimension_numbers = #tpu.dot_dimension_numbers<[1], [0], [0], [1], [0, 0, 1, 1], [], []>} : vector<16x32xf32>, vector<32x32xf32>, vector<16x32xf32> -> vector<16x32xf32>
    %21 = vector.broadcast %6 : vector<1x32xf32> to vector<16x32xf32>
    %22 = arith.addf %20, %21 : vector<16x32xf32>
    %23 = vector.extract_strided_slice %14 {offsets = [0, 0], sizes = [16, 8], strides = [1, 1]} : vector<16x32xf32> to vector<16x8xf32>
    %24 = vector.extract_strided_slice %18 {offsets = [0, 0], sizes = [16, 8], strides = [1, 1]} : vector<16x32xf32> to vector<16x8xf32>
    %25 = vector.extract_strided_slice %22 {offsets = [0, 0], sizes = [16, 8], strides = [1, 1]} : vector<16x32xf32> to vector<16x8xf32>
    %26 = vector.extract_strided_slice %23 {offsets = [0, 0], sizes = [8, 8], strides = [1, 1]} : vector<16x8xf32> to vector<8x8xf32>
    %27 = vector.extract_strided_slice %24 {offsets = [0, 0], sizes = [8, 8], strides = [1, 1]} : vector<16x8xf32> to vector<8x8xf32>
    %28 = vector.extract_strided_slice %25 {offsets = [0, 0], sizes = [8, 8], strides = [1, 1]} : vector<16x8xf32> to vector<8x8xf32>
    %cst_19 = arith.constant dense<0.000000e+00> : vector<8x8xf32>
    %29 = tpu.matmul %26, %27, %cst_19 {dimension_numbers = #tpu.dot_dimension_numbers<[1], [1], [0], [0], [0, 0, 1, 0], [], []>} : vector<8x8xf32>, vector<8x8xf32>, vector<8x8xf32> -> vector<8x8xf32>
    %30 = vector.broadcast %8 : vector<1x8xf32> to vector<8x8xf32>
    %31 = arith.addf %29, %30 : vector<8x8xf32>
    %cst_20 = arith.constant dense<0xFF800000> : vector<8xf32>
    %32 = vector.multi_reduction <maximumf>, %31, %cst_20 [1] : vector<8x8xf32> to vector<8xf32>
    %33 = vector.shape_cast %32 : vector<8xf32> to vector<8x1xf32>
    %34 = vector.broadcast %33 : vector<8x1xf32> to vector<8x8xf32>
    %35 = arith.subf %31, %34 : vector<8x8xf32>
    %36 = math.exp %35 : vector<8x8xf32>
    %cst_21 = arith.constant dense<0.000000e+00> : vector<8xf32>
    %37 = vector.multi_reduction <add>, %36, %cst_21 [1] : vector<8x8xf32> to vector<8xf32>
    %38 = vector.shape_cast %37 : vector<8xf32> to vector<8x1xf32>
    %39 = vector.broadcast %38 : vector<8x1xf32> to vector<8x8xf32>
    %40 = arith.divf %36, %39 : vector<8x8xf32>
    %cst_22 = arith.constant dense<0.000000e+00> : vector<8x8xf32>
    %41 = tpu.matmul %40, %28, %cst_22 {dimension_numbers = #tpu.dot_dimension_numbers<[1], [0], [0], [1], [0, 0, 1, 1], [], []>} : vector<8x8xf32>, vector<8x8xf32>, vector<8x8xf32> -> vector<8x8xf32>
    %c0_23 = arith.constant 0 : index
    %c0_24 = arith.constant 0 : index
    %42 = vector.load %arg7[%c0_23, %c0_24] : memref<16x32xf32, #tpu.memory_space<vmem>>, vector<8x8xf32>
    tpu.vector_store %arg7[%c0_23, %c0_24], %41 {strides = array<i32>} : memref<16x32xf32, #tpu.memory_space<vmem>>, vector<8x8xf32>,
    %43 = vector.extract_strided_slice %23 {offsets = [8, 0], sizes = [8, 8], strides = [1, 1]} : vector<16x8xf32> to vector<8x8xf32>
    %44 = vector.extract_strided_slice %24 {offsets = [8, 0], sizes = [8, 8], strides = [1, 1]} : vector<16x8xf32> to vector<8x8xf32>
    %45 = vector.extract_strided_slice %25 {offsets = [8, 0], sizes = [8, 8], strides = [1, 1]} : vector<16x8xf32> to vector<8x8xf32>
    %cst_25 = arith.constant dense<0.000000e+00> : vector<8x8xf32>
    %46 = tpu.matmul %43, %44, %cst_25 {dimension_numbers = #tpu.dot_dimension_numbers<[1], [1], [0], [0], [0, 0, 1, 0], [], []>} : vector<8x8xf32>, vector<8x8xf32>, vector<8x8xf32> -> vector<8x8xf32>
    %47 = vector.broadcast %8 : vector<1x8xf32> to vector<8x8xf32>
    %48 = arith.addf %46, %47 : vector<8x8xf32>
    %cst_26 = arith.constant dense<0xFF800000> : vector<8xf32>
    %49 = vector.multi_reduction <maximumf>, %48, %cst_26 [1] : vector<8x8xf32> to vector<8xf32>
    %50 = vector.shape_cast %49 : vector<8xf32> to vector<8x1xf32>
    %51 = vector.broadcast %50 : vector<8x1xf32> to vector<8x8xf32>
    %52 = arith.subf %48, %51 : vector<8x8xf32>
    %53 = math.exp %52 : vector<8x8xf32>
    %cst_27 = arith.constant dense<0.000000e+00> : vector<8xf32>
    %54 = vector.multi_reduction <add>, %53, %cst_27 [1] : vector<8x8xf32> to vector<8xf32>
    %55 = vector.shape_cast %54 : vector<8xf32> to vector<8x1xf32>
    %56 = vector.broadcast %55 : vector<8x1xf32> to vector<8x8xf32>
    %57 = arith.divf %53, %56 : vector<8x8xf32>
    %cst_28 = arith.constant dense<0.000000e+00> : vector<8x8xf32>
    %58 = tpu.matmul %57, %45, %cst_28 {dimension_numbers = #tpu.dot_dimension_numbers<[1], [0], [0], [1], [0, 0, 1, 1], [], []>} : vector<8x8xf32>, vector<8x8xf32>, vector<8x8xf32> -> vector<8x8xf32>
    %c8 = arith.constant 8 : index
    %c0_29 = arith.constant 0 : index
    %59 = vector.load %arg7[%c8, %c0_29] : memref<16x32xf32, #tpu.memory_space<vmem>>, vector<8x8xf32>
    tpu.vector_store %arg7[%c8, %c0_29], %58 {strides = array<i32>} : memref<16x32xf32, #tpu.memory_space<vmem>>, vector<8x8xf32>,
    %60 = vector.extract_strided_slice %14 {offsets = [0, 8], sizes = [16, 8], strides = [1, 1]} : vector<16x32xf32> to vector<16x8xf32>
    %61 = vector.extract_strided_slice %18 {offsets = [0, 8], sizes = [16, 8], strides = [1, 1]} : vector<16x32xf32> to vector<16x8xf32>
    %62 = vector.extract_strided_slice %22 {offsets = [0, 8], sizes = [16, 8], strides = [1, 1]} : vector<16x32xf32> to vector<16x8xf32>
    %63 = vector.extract_strided_slice %60 {offsets = [0, 0], sizes = [8, 8], strides = [1, 1]} : vector<16x8xf32> to vector<8x8xf32>
    %64 = vector.extract_strided_slice %61 {offsets = [0, 0], sizes = [8, 8], strides = [1, 1]} : vector<16x8xf32> to vector<8x8xf32>
    %65 = vector.extract_strided_slice %62 {offsets = [0, 0], sizes = [8, 8], strides = [1, 1]} : vector<16x8xf32> to vector<8x8xf32>
    %cst_30 = arith.constant dense<0.000000e+00> : vector<8x8xf32>
    %66 = tpu.matmul %63, %64, %cst_30 {dimension_numbers = #tpu.dot_dimension_numbers<[1], [1], [0], [0], [0, 0, 1, 0], [], []>} : vector<8x8xf32>, vector<8x8xf32>, vector<8x8xf32> -> vector<8x8xf32>
    %67 = vector.broadcast %8 : vector<1x8xf32> to vector<8x8xf32>
    %68 = arith.addf %66, %67 : vector<8x8xf32>
    %cst_31 = arith.constant dense<0xFF800000> : vector<8xf32>
    %69 = vector.multi_reduction <maximumf>, %68, %cst_31 [1] : vector<8x8xf32> to vector<8xf32>
    %70 = vector.shape_cast %69 : vector<8xf32> to vector<8x1xf32>
    %71 = vector.broadcast %70 : vector<8x1xf32> to vector<8x8xf32>
    %72 = arith.subf %68, %71 : vector<8x8xf32>
    %73 = math.exp %72 : vector<8x8xf32>
    %cst_32 = arith.constant dense<0.000000e+00> : vector<8xf32>
    %74 = vector.multi_reduction <add>, %73, %cst_32 [1] : vector<8x8xf32> to vector<8xf32>
    %75 = vector.shape_cast %74 : vector<8xf32> to vector<8x1xf32>
    %76 = vector.broadcast %75 : vector<8x1xf32> to vector<8x8xf32>
    %77 = arith.divf %73, %76 : vector<8x8xf32>
    %cst_33 = arith.constant dense<0.000000e+00> : vector<8x8xf32>
    %78 = tpu.matmul %77, %65, %cst_33 {dimension_numbers = #tpu.dot_dimension_numbers<[1], [0], [0], [1], [0, 0, 1, 1], [], []>} : vector<8x8xf32>, vector<8x8xf32>, vector<8x8xf32> -> vector<8x8xf32>
    %c0_34 = arith.constant 0 : index
    %c8_35 = arith.constant 8 : index
    %79 = vector.load %arg7[%c0_34, %c8_35] : memref<16x32xf32, #tpu.memory_space<vmem>>, vector<8x8xf32>
    tpu.vector_store %arg7[%c0_34, %c8_35], %78 {strides = array<i32>} : memref<16x32xf32, #tpu.memory_space<vmem>>, vector<8x8xf32>,
    %80 = vector.extract_strided_slice %60 {offsets = [8, 0], sizes = [8, 8], strides = [1, 1]} : vector<16x8xf32> to vector<8x8xf32>
    %81 = vector.extract_strided_slice %61 {offsets = [8, 0], sizes = [8, 8], strides = [1, 1]} : vector<16x8xf32> to vector<8x8xf32>
    %82 = vector.extract_strided_slice %62 {offsets = [8, 0], sizes = [8, 8], strides = [1, 1]} : vector<16x8xf32> to vector<8x8xf32>
    %cst_36 = arith.constant dense<0.000000e+00> : vector<8x8xf32>
    %83 = tpu.matmul %80, %81, %cst_36 {dimension_numbers = #tpu.dot_dimension_numbers<[1], [1], [0], [0], [0, 0, 1, 0], [], []>} : vector<8x8xf32>, vector<8x8xf32>, vector<8x8xf32> -> vector<8x8xf32>
    %84 = vector.broadcast %8 : vector<1x8xf32> to vector<8x8xf32>
    %85 = arith.addf %83, %84 : vector<8x8xf32>
    %cst_37 = arith.constant dense<0xFF800000> : vector<8xf32>
    %86 = vector.multi_reduction <maximumf>, %85, %cst_37 [1] : vector<8x8xf32> to vector<8xf32>
    %87 = vector.shape_cast %86 : vector<8xf32> to vector<8x1xf32>
    %88 = vector.broadcast %87 : vector<8x1xf32> to vector<8x8xf32>
    %89 = arith.subf %85, %88 : vector<8x8xf32>
    %90 = math.exp %89 : vector<8x8xf32>
    %cst_38 = arith.constant dense<0.000000e+00> : vector<8xf32>
    %91 = vector.multi_reduction <add>, %90, %cst_38 [1] : vector<8x8xf32> to vector<8xf32>
    %92 = vector.shape_cast %91 : vector<8xf32> to vector<8x1xf32>
    %93 = vector.broadcast %92 : vector<8x1xf32> to vector<8x8xf32>
    %94 = arith.divf %90, %93 : vector<8x8xf32>
    %cst_39 = arith.constant dense<0.000000e+00> : vector<8x8xf32>
    %95 = tpu.matmul %94, %82, %cst_39 {dimension_numbers = #tpu.dot_dimension_numbers<[1], [0], [0], [1], [0, 0, 1, 1], [], []>} : vector<8x8xf32>, vector<8x8xf32>, vector<8x8xf32> -> vector<8x8xf32>
    %c8_40 = arith.constant 8 : index
    %c8_41 = arith.constant 8 : index
    %96 = vector.load %arg7[%c8_40, %c8_41] : memref<16x32xf32, #tpu.memory_space<vmem>>, vector<8x8xf32>
    tpu.vector_store %arg7[%c8_40, %c8_41], %95 {strides = array<i32>} : memref<16x32xf32, #tpu.memory_space<vmem>>, vector<8x8xf32>,
    %97 = vector.extract_strided_slice %14 {offsets = [0, 16], sizes = [16, 8], strides = [1, 1]} : vector<16x32xf32> to vector<16x8xf32>
    %98 = vector.extract_strided_slice %18 {offsets = [0, 16], sizes = [16, 8], strides = [1, 1]} : vector<16x32xf32> to vector<16x8xf32>
    %99 = vector.extract_strided_slice %22 {offsets = [0, 16], sizes = [16, 8], strides = [1, 1]} : vector<16x32xf32> to vector<16x8xf32>
    %100 = vector.extract_strided_slice %97 {offsets = [0, 0], sizes = [8, 8], strides = [1, 1]} : vector<16x8xf32> to vector<8x8xf32>
    %101 = vector.extract_strided_slice %98 {offsets = [0, 0], sizes = [8, 8], strides = [1, 1]} : vector<16x8xf32> to vector<8x8xf32>
    %102 = vector.extract_strided_slice %99 {offsets = [0, 0], sizes = [8, 8], strides = [1, 1]} : vector<16x8xf32> to vector<8x8xf32>
    %cst_42 = arith.constant dense<0.000000e+00> : vector<8x8xf32>
    %103 = tpu.matmul %100, %101, %cst_42 {dimension_numbers = #tpu.dot_dimension_numbers<[1], [1], [0], [0], [0, 0, 1, 0], [], []>} : vector<8x8xf32>, vector<8x8xf32>, vector<8x8xf32> -> vector<8x8xf32>
    %104 = vector.broadcast %8 : vector<1x8xf32> to vector<8x8xf32>
    %105 = arith.addf %103, %104 : vector<8x8xf32>
    %cst_43 = arith.constant dense<0xFF800000> : vector<8xf32>
    %106 = vector.multi_reduction <maximumf>, %105, %cst_43 [1] : vector<8x8xf32> to vector<8xf32>
    %107 = vector.shape_cast %106 : vector<8xf32> to vector<8x1xf32>
    %108 = vector.broadcast %107 : vector<8x1xf32> to vector<8x8xf32>
    %109 = arith.subf %105, %108 : vector<8x8xf32>
    %110 = math.exp %109 : vector<8x8xf32>
    %cst_44 = arith.constant dense<0.000000e+00> : vector<8xf32>
    %111 = vector.multi_reduction <add>, %110, %cst_44 [1] : vector<8x8xf32> to vector<8xf32>
    %112 = vector.shape_cast %111 : vector<8xf32> to vector<8x1xf32>
    %113 = vector.broadcast %112 : vector<8x1xf32> to vector<8x8xf32>
    %114 = arith.divf %110, %113 : vector<8x8xf32>
    %cst_45 = arith.constant dense<0.000000e+00> : vector<8x8xf32>
    %115 = tpu.matmul %114, %102, %cst_45 {dimension_numbers = #tpu.dot_dimension_numbers<[1], [0], [0], [1], [0, 0, 1, 1], [], []>} : vector<8x8xf32>, vector<8x8xf32>, vector<8x8xf32> -> vector<8x8xf32>
    %c0_46 = arith.constant 0 : index
    %c16 = arith.constant 16 : index
    %116 = vector.load %arg7[%c0_46, %c16] : memref<16x32xf32, #tpu.memory_space<vmem>>, vector<8x8xf32>
    tpu.vector_store %arg7[%c0_46, %c16], %115 {strides = array<i32>} : memref<16x32xf32, #tpu.memory_space<vmem>>, vector<8x8xf32>,
    %117 = vector.extract_strided_slice %97 {offsets = [8, 0], sizes = [8, 8], strides = [1, 1]} : vector<16x8xf32> to vector<8x8xf32>
    %118 = vector.extract_strided_slice %98 {offsets = [8, 0], sizes = [8, 8], strides = [1, 1]} : vector<16x8xf32> to vector<8x8xf32>
    %119 = vector.extract_strided_slice %99 {offsets = [8, 0], sizes = [8, 8], strides = [1, 1]} : vector<16x8xf32> to vector<8x8xf32>
    %cst_47 = arith.constant dense<0.000000e+00> : vector<8x8xf32>
    %120 = tpu.matmul %117, %118, %cst_47 {dimension_numbers = #tpu.dot_dimension_numbers<[1], [1], [0], [0], [0, 0, 1, 0], [], []>} : vector<8x8xf32>, vector<8x8xf32>, vector<8x8xf32> -> vector<8x8xf32>
    %121 = vector.broadcast %8 : vector<1x8xf32> to vector<8x8xf32>
    %122 = arith.addf %120, %121 : vector<8x8xf32>
    %cst_48 = arith.constant dense<0xFF800000> : vector<8xf32>
    %123 = vector.multi_reduction <maximumf>, %122, %cst_48 [1] : vector<8x8xf32> to vector<8xf32>
    %124 = vector.shape_cast %123 : vector<8xf32> to vector<8x1xf32>
    %125 = vector.broadcast %124 : vector<8x1xf32> to vector<8x8xf32>
    %126 = arith.subf %122, %125 : vector<8x8xf32>
    %127 = math.exp %126 : vector<8x8xf32>
    %cst_49 = arith.constant dense<0.000000e+00> : vector<8xf32>
    %128 = vector.multi_reduction <add>, %127, %cst_49 [1] : vector<8x8xf32> to vector<8xf32>
    %129 = vector.shape_cast %128 : vector<8xf32> to vector<8x1xf32>
    %130 = vector.broadcast %129 : vector<8x1xf32> to vector<8x8xf32>
    %131 = arith.divf %127, %130 : vector<8x8xf32>
    %cst_50 = arith.constant dense<0.000000e+00> : vector<8x8xf32>
    %132 = tpu.matmul %131, %119, %cst_50 {dimension_numbers = #tpu.dot_dimension_numbers<[1], [0], [0], [1], [0, 0, 1, 1], [], []>} : vector<8x8xf32>, vector<8x8xf32>, vector<8x8xf32> -> vector<8x8xf32>
    %c8_51 = arith.constant 8 : index
    %c16_52 = arith.constant 16 : index
    %133 = vector.load %arg7[%c8_51, %c16_52] : memref<16x32xf32, #tpu.memory_space<vmem>>, vector<8x8xf32>
    tpu.vector_store %arg7[%c8_51, %c16_52], %132 {strides = array<i32>} : memref<16x32xf32, #tpu.memory_space<vmem>>, vector<8x8xf32>,
    %134 = vector.extract_strided_slice %14 {offsets = [0, 24], sizes = [16, 8], strides = [1, 1]} : vector<16x32xf32> to vector<16x8xf32>
    %135 = vector.extract_strided_slice %18 {offsets = [0, 24], sizes = [16, 8], strides = [1, 1]} : vector<16x32xf32> to vector<16x8xf32>
    %136 = vector.extract_strided_slice %22 {offsets = [0, 24], sizes = [16, 8], strides = [1, 1]} : vector<16x32xf32> to vector<16x8xf32>
    %137 = vector.extract_strided_slice %134 {offsets = [0, 0], sizes = [8, 8], strides = [1, 1]} : vector<16x8xf32> to vector<8x8xf32>
    %138 = vector.extract_strided_slice %135 {offsets = [0, 0], sizes = [8, 8], strides = [1, 1]} : vector<16x8xf32> to vector<8x8xf32>
    %139 = vector.extract_strided_slice %136 {offsets = [0, 0], sizes = [8, 8], strides = [1, 1]} : vector<16x8xf32> to vector<8x8xf32>
    %cst_53 = arith.constant dense<0.000000e+00> : vector<8x8xf32>
    %140 = tpu.matmul %137, %138, %cst_53 {dimension_numbers = #tpu.dot_dimension_numbers<[1], [1], [0], [0], [0, 0, 1, 0], [], []>} : vector<8x8xf32>, vector<8x8xf32>, vector<8x8xf32> -> vector<8x8xf32>
    %141 = vector.broadcast %8 : vector<1x8xf32> to vector<8x8xf32>
    %142 = arith.addf %140, %141 : vector<8x8xf32>
    %cst_54 = arith.constant dense<0xFF800000> : vector<8xf32>
    %143 = vector.multi_reduction <maximumf>, %142, %cst_54 [1] : vector<8x8xf32> to vector<8xf32>
    %144 = vector.shape_cast %143 : vector<8xf32> to vector<8x1xf32>
    %145 = vector.broadcast %144 : vector<8x1xf32> to vector<8x8xf32>
    %146 = arith.subf %142, %145 : vector<8x8xf32>
    %147 = math.exp %146 : vector<8x8xf32>
    %cst_55 = arith.constant dense<0.000000e+00> : vector<8xf32>
    %148 = vector.multi_reduction <add>, %147, %cst_55 [1] : vector<8x8xf32> to vector<8xf32>
    %149 = vector.shape_cast %148 : vector<8xf32> to vector<8x1xf32>
    %150 = vector.broadcast %149 : vector<8x1xf32> to vector<8x8xf32>
    %151 = arith.divf %147, %150 : vector<8x8xf32>
    %cst_56 = arith.constant dense<0.000000e+00> : vector<8x8xf32>
    %152 = tpu.matmul %151, %139, %cst_56 {dimension_numbers = #tpu.dot_dimension_numbers<[1], [0], [0], [1], [0, 0, 1, 1], [], []>} : vector<8x8xf32>, vector<8x8xf32>, vector<8x8xf32> -> vector<8x8xf32>
    %c0_57 = arith.constant 0 : index
    %c24 = arith.constant 24 : index
    %153 = vector.load %arg7[%c0_57, %c24] : memref<16x32xf32, #tpu.memory_space<vmem>>, vector<8x8xf32>
    tpu.vector_store %arg7[%c0_57, %c24], %152 {strides = array<i32>} : memref<16x32xf32, #tpu.memory_space<vmem>>, vector<8x8xf32>,
    %154 = vector.extract_strided_slice %134 {offsets = [8, 0], sizes = [8, 8], strides = [1, 1]} : vector<16x8xf32> to vector<8x8xf32>
    %155 = vector.extract_strided_slice %135 {offsets = [8, 0], sizes = [8, 8], strides = [1, 1]} : vector<16x8xf32> to vector<8x8xf32>
    %156 = vector.extract_strided_slice %136 {offsets = [8, 0], sizes = [8, 8], strides = [1, 1]} : vector<16x8xf32> to vector<8x8xf32>
    %cst_58 = arith.constant dense<0.000000e+00> : vector<8x8xf32>
    %157 = tpu.matmul %154, %155, %cst_58 {dimension_numbers = #tpu.dot_dimension_numbers<[1], [1], [0], [0], [0, 0, 1, 0], [], []>} : vector<8x8xf32>, vector<8x8xf32>, vector<8x8xf32> -> vector<8x8xf32>
    %158 = vector.broadcast %8 : vector<1x8xf32> to vector<8x8xf32>
    %159 = arith.addf %157, %158 : vector<8x8xf32>
    %cst_59 = arith.constant dense<0xFF800000> : vector<8xf32>
    %160 = vector.multi_reduction <maximumf>, %159, %cst_59 [1] : vector<8x8xf32> to vector<8xf32>
    %161 = vector.shape_cast %160 : vector<8xf32> to vector<8x1xf32>
    %162 = vector.broadcast %161 : vector<8x1xf32> to vector<8x8xf32>
    %163 = arith.subf %159, %162 : vector<8x8xf32>
    %164 = math.exp %163 : vector<8x8xf32>
    %cst_60 = arith.constant dense<0.000000e+00> : vector<8xf32>
    %165 = vector.multi_reduction <add>, %164, %cst_60 [1] : vector<8x8xf32> to vector<8xf32>
    %166 = vector.shape_cast %165 : vector<8xf32> to vector<8x1xf32>
    %167 = vector.broadcast %166 : vector<8x1xf32> to vector<8x8xf32>
    %168 = arith.divf %164, %167 : vector<8x8xf32>
    %cst_61 = arith.constant dense<0.000000e+00> : vector<8x8xf32>
    %169 = tpu.matmul %168, %156, %cst_61 {dimension_numbers = #tpu.dot_dimension_numbers<[1], [0], [0], [1], [0, 0, 1, 1], [], []>} : vector<8x8xf32>, vector<8x8xf32>, vector<8x8xf32> -> vector<8x8xf32>
    %c8_62 = arith.constant 8 : index
    %c24_63 = arith.constant 24 : index
    %170 = vector.load %arg7[%c8_62, %c24_63] : memref<16x32xf32, #tpu.memory_space<vmem>>, vector<8x8xf32>
    tpu.vector_store %arg7[%c8_62, %c24_63], %169 {strides = array<i32>} : memref<16x32xf32, #tpu.memory_space<vmem>>, vector<8x8xf32>,
    %c0_64 = arith.constant 0 : index
    %c0_65 = arith.constant 0 : index
    %171 = vector.load %arg7[%c0_64, %c0_65] : memref<16x32xf32, #tpu.memory_space<vmem>>, vector<16x32xf32>
    %cst_66 = arith.constant dense<0.000000e+00> : vector<16x32xf32>
    %172 = tpu.matmul %171, %3, %cst_66 {dimension_numbers = #tpu.dot_dimension_numbers<[1], [0], [0], [1], [0, 0, 1, 1], [], []>} : vector<16x32xf32>, vector<32x32xf32>, vector<16x32xf32> -> vector<16x32xf32>
    %173 = vector.broadcast %7 : vector<1x32xf32> to vector<16x32xf32>
    %174 = arith.addf %172, %173 : vector<16x32xf32>
    %c0_67 = arith.constant 0 : index
    %c0_68 = arith.constant 0 : index
    %175 = vector.load %arg6[%c0_67, %c0_68] : memref<16x32xf32, #tpu.memory_space<vmem>>, vector<16x32xf32>
    tpu.vector_store %arg6[%c0_67, %c0_68], %174 {strides = array<i32>} : memref<16x32xf32, #tpu.memory_space<vmem>>, vector<16x32xf32>,
    return
  }
  func.func @transform_0(%arg0: i32) -> (i32, i32) {
    %c0_i32 = arith.constant 0 : i32
    %c0_i32_0 = arith.constant 0 : i32
    %c0_i32_1 = arith.constant 0 : i32
    return %c0_i32, %c0_i32_0 : i32, i32
  }
  func.func @transform_1(%arg0: i32) -> (i32, i32) {
    %c0_i32 = arith.constant 0 : i32
    %c0_i32_0 = arith.constant 0 : i32
    %c0_i32_1 = arith.constant 0 : i32
    return %c0_i32, %c0_i32_0 : i32, i32
  }
  func.func @transform_2(%arg0: i32) -> (i32, i32) {
    %c0_i32 = arith.constant 0 : i32
    %c0_i32_0 = arith.constant 0 : i32
    %c0_i32_1 = arith.constant 0 : i32
    return %c0_i32, %c0_i32_0 : i32, i32
  }
  func.func @transform_3(%arg0: i32) -> (i32, i32) {
    %c0_i32 = arith.constant 0 : i32
    %c0_i32_0 = arith.constant 0 : i32
    %c0_i32_1 = arith.constant 0 : i32
    return %c0_i32, %c0_i32_0 : i32, i32
  }
  func.func @transform_4(%arg0: i32) -> (i32, i32) {
    %c0_i32 = arith.constant 0 : i32
    %c0_i32_0 = arith.constant 0 : i32
    %c0_i32_1 = arith.constant 0 : i32
    return %c0_i32, %c0_i32_0 : i32, i32
  }
  func.func @transform_5(%arg0: i32) -> (i32, i32) {
    %c0_i32 = arith.constant 0 : i32
    %c0_i32_0 = arith.constant 0 : i32
    %c0_i32_1 = arith.constant 0 : i32
    return %c0_i32, %c0_i32_0 : i32, i32
  }
}

</mosaic_0001>

<bundles_post_ra>
// kernel: tpu_custom_call.1
= control target key start
LH: loop header
LB: loop body
LE: loop exit
PB: predicated region body
PF: predicated region fallthrough
CT: control target
= control target key end

     0   :  { %s2339_s0 = inlined_call_operand.vmem [shape: f32[16,32], index: 0, kind: input, shape index: {}]   ;;  %s2340_s1 = inlined_call_operand.vmem [shape: f32[16,32], index: 1, kind: input, shape index: {}]   ;;  %s2341_s2 = inlined_call_operand.vmem [shape: f32[16,32], index: 2, kind: input, shape index: {}]   ;;  %s2342_s3 = inlined_call_operand.vmem [shape: f32[128,32], index: 3, kind: input, shape index: {}]   ;;  %s2343_s4 = inlined_call_operand.vmem [shape: f32[8,32], index: 4, kind: input, shape index: {}]   ;;  %s2344_s5 = inlined_call_operand.hbm [shape: f32[16,32], index: 5, kind: output, shape index: {}]  }
   0x1   :  { %v24_v0 = vld [vmem:[%s2342_s3 + $0x18] sm:$0xff]  ;;  %v23_v2 = vld [vmem:[%s2342_s3 + $0x10] sm:$0xff]  ;;  %v22_v4 = vld [vmem:[%s2342_s3 + $0x8] sm:$0xff] }
   0x2   :  { %v28_v1 = vld [vmem:[%s2342_s3 + $0x38] sm:$0xff]  ;;  %1856 = vmatprep.subr.mxu0 %v24_v0  ;;  %v27_v3 = vld [vmem:[%s2342_s3 + $0x30] sm:$0xff]  ;;  %v26_v5 = vld [vmem:[%s2342_s3 + $0x28] sm:$0xff] }
   0x3   :  { %1867 = vmatprep.subr.mxu1 %v28_v1  ;;  %1857 = vmatpush3.msra.mxu0 %v24_v0  ;;  %v21_v6 = vld [vmem:[%s2342_s3] sm:$0xff] }
   0x4   :  { %1868 = vmatpush3.msra.mxu1 %v28_v1  ;;  %1858 = vmatprep.subr.mxu0 %v23_v2  ;;  %v25_v7 = vld [vmem:[%s2342_s3 + $0x20] sm:$0xff] }
   0x5   :  { %1869 = vmatprep.subr.mxu1 %v27_v3  ;;  %1859 = vmatpush3.msra.mxu0 %v23_v2 }
   0x6   :  { %1870 = vmatpush3.msra.mxu1 %v27_v3 }
   0x7   :  { %10 = vsyncpa [#allocation4], 0  ;;  %1860 = vmatprep.subr.mxu0 %v22_v4  ;;  %1871 = vmatprep.subr.mxu1 %v26_v5  ;;  %v42_v8 = vld [vmem:[%s2339_s0] sm:$0xff]  ;;  %vm48_vm0 = vcmask 261120   ;;  %v43_v10 = vld [vmem:[%s2339_s0 + $0x8] sm:$0xff]  ;;  %v2044_v12 = vmov 0.0  }
   0x8   :  { %1861 = vmatpush3.msra.mxu0 %v22_v4  ;;  %1872 = vmatpush3.msra.mxu1 %v26_v5  ;;  %v132_v9 = vld [vmem:[%s2340_s1] sm:$0xff]  ;;  %v133_v11 = vld [vmem:[%s2340_s1 + $0x8] sm:$0xff]  ;;  %vm2045_vm1 = vmmov 0   ;;  %v32_v13 = vld [vmem:[%s2342_s3 + $0x58] sm:$0xff]  ;;  %vm310_vm2 = vcmask 64512   ;;  %s2047_s6 = smov 112  }
   0x9   :  { %1862 = vmatprep.subr.mxu0 %v21_v6  ;;  %1873 = vmatprep.subr.mxu1 %v25_v7  ;;  %v31_v14 = vld [vmem:[%s2342_s3 + $0x50] sm:$0xff]  ;;  %v30_v15 = vld [vmem:[%s2342_s3 + $0x48] sm:$0xff]  ;;  %v29_v16 = vld [vmem:[%s2342_s3 + $0x40] sm:$0xff]  ;;  %s2048_s7 = smov 104   ;;  %s2049_s12 = smov 8   ;;  %vm803_vm3 = vcmask 130112  }
   0xa   :  { %1863 = vmatpush3.msra.mxu0 %v21_v6  ;;  %1864 = vmatprep.mubr.msk.f32.mxu0 %vm48_vm0, %v42_v8  ;;  %v219_v17 = vld [vmem:[%s2341_s2] sm:$0xff]  ;;  %v220_v18 = vld [vmem:[%s2341_s2 + $0x8] sm:$0xff]  ;;  %s2046_s2 = smov 120   ;;  %s2050_s0 = smov 16   ;;  %vm1145_vm4 = vcmask 195712   ;;  %vm1486_vm5 = vcmask 261312  }
   0xb   :  { %1874 = vmatpush3.msra.mxu1 %v25_v7  ;;  %1875 = vmatprep.mubr.msk.f32.mxu1 %vm48_vm0, %v132_v9  ;;  %v1763_v20 = vld [vmem:[%s2343_s4] ss:$0 sm:$0xff]  ;;  %v1766_v22 = vld [vmem:[%s2343_s4 + $0x1] ss:$0 sm:$0xff]  ;;  %v1769_v34 = vld [vmem:[%s2343_s4 + $0x2] ss:$0 sm:$0xff] }
   0xc   :  { %1865 = vmatmul.mubr.msk.f32.vlgmr.msra.gmra.mxu0 %vm48_vm0, %v43_v10  ;;  %1876 = vmatmul.mubr.msk.f32.vlgmr.msra.gmra.mxu1 %vm48_vm0, %v133_v11  ;;  %v2195_v38 = vld [vmem:[%s2343_s4 + $0x4] ss:$0 sm:$0xff]  ;;  %s2051_s20 = smov 24   ;;  %s2052_s22 = smov [#allocation3]  }
   0xd   :  { %1889 = vmatprep.subr.mxu1 %v2044_v12  ;;  %1891 = vmatprep.mubr.msk.f32.mxu1 %vm2045_vm1, %v2044_v12  ;;  %s1752_s23 = sshll.u32 %s2052_s22, 4  ;;  %s1753_s23 = int_to_ptr.vmem [resolvable:$true] %s1752_s23 }
   0xe   :  { %1878 = vmatprep.subr.mxu0 %v32_v13  ;;  %1886 = vmatprep.mubr.msk.f32.mxu0 %vm48_vm0, %v219_v17  ;;  %s2022_s24 = scalar_lea.vmem %s1753_s23, 256  ;;  %p2027_p1 = scmp.lt.s32.totalorder %s1753_s23, %s1753_s23 }
   0xf   :  { %1879 = vmatpush3.msra.mxu0 %v32_v13  ;;  %p2023_p0 = scmp.ne.s32.totalorder %s1753_s23, %s2022_s24  ;;  %p2028_p2 = scmp.lt.s32.totalorder %s2022_s24, %s2022_s24 }
  0x10   :  { %1880 = vmatprep.subr.mxu0 %v31_v14 }
  0x11   :  { %1881 = vmatpush3.msra.mxu0 %v31_v14  ;;  %p2029_p3 = por %p2028_p2, %p2027_p1 }
  0x12   :  { %1882 = vmatprep.subr.mxu0 %v30_v15 }
  0x13   :  { %1883 = vmatpush3.msra.mxu0 %v30_v15  ;;  %p2030_p4 = pnand %p2029_p3, %p2023_p0 }
  0x14   :  { %1884 = vmatprep.subr.mxu0 %v29_v16 }
  0x15   :  { %1885 = vmatpush3.msra.mxu0 %v29_v16 }
  0x16   :  { %1909 = vmatprep.subr.mxu0 %v2044_v12  ;;  %1887 = vmatmul.mubr.msk.f32.vlgmr.msra.gmra.mxu0 %vm48_vm0, %v220_v18 }
  0x17   :  { %1911 = vmatprep.mubr.msk.f32.mxu0 %vm2045_vm1, %v2044_v12 }
  0xcc   :  { %v1866_v19 = vpop.f32.mrf.mxu0  ;;  %v1877_v21 = vpop.f32.mrf.mxu1 }
  0xcd   :  { %v127_v28 = vadd.f32 %v1866_v19, %v1763_v20  ;;  %v2169_v30 = vadd.f32 %v1877_v21, %v1766_v22 }
  0xce   :  { %v121_v23 = vpop.f32.mrf.mxu0  ;;  %v210_v24 = vpop.f32.mrf.mxu1 }
  0xcf   :  { %v122_v25 = vadd.f32 %v1763_v20, %v121_v23  ;;  %v211_v26 = vadd.f32 %v1766_v22, %v210_v24  ;;  %v2163_v29 = vmul.f32 0.35355338, %v127_v28 }
  0xd1   :  { %v130_v27 = vmul.f32 0.35355338, %v122_v25  ;;  %635 = vrot.lane.b32.xlu1 %v211_v26, %s2046_s2  ;;  %1890 = vmatpush3.xpose.msk.msra.mxu1 %vm310_vm2, %v211_v26 }
  0xd2   :  { %1894 = vmatprep.subr.mxu1 %v2044_v12 }
  0xd4   :  { %1892 = vmatmul.mubr.msk.f32.vlgmr.msra.gmra.mxu1 %vm310_vm2, %v130_v27 }
  0xd5   :  { %633 = vrot.lane.b32.xlu1 %v130_v27, %s2046_s2  ;;  %1896 = vmatprep.mubr.msk.f32.mxu1 %vm2045_vm1, %v2044_v12 }
  0xd6   :  { %v1888_v33 = vpop.f32.mrf.mxu0 }
  0xd7   :  { %v2186_v35 = vadd.f32 %v1888_v33, %v1769_v34 }
  0xd8   :  { %v297_v36 = vpop.f32.mrf.mxu0 }
  0xd9   :  { %805 = vrot.lane.b32.xlu1 %v2163_v29, %s2046_s2  ;;  %v2188_v37 = vadd.f32 %v1769_v34, %v297_v36 }
  0xdb   :  { %1895 = vmatpush3.msra.mxu1 %v2188_v37 }
  0xdc   :  { %1899 = vmatprep.subr.mxu1 %v2044_v12 }
  0xdd   :  { %978 = vrot.lane.b32.xlu1 %v211_v26, %s2047_s6 }
  0xe1   :  { %976 = vrot.lane.b32.xlu1 %v130_v27, %s2047_s6 }
  0xe5   :  { %1149 = vrot.lane.b32.xlu1 %v2169_v30, %s2047_s6 }
  0xe9   :  { %1147 = vrot.lane.b32.xlu1 %v2163_v29, %s2047_s6 }
  0xed   :  { %1319 = vrot.lane.b32.xlu1 %v211_v26, %s2048_s7 }
  0xf1   :  { %1490 = vrot.lane.b32.xlu1 %v2169_v30, %s2048_s7 }
 0x143   :  { %v636_v31 = vpop.permute.xlu1 %635 }
 0x144   :  { %1910 = vmatpush3.xpose.msk.msra.mxu0 %vm310_vm2, %v636_v31 }
 0x145   :  { %1919 = vmatprep.subr.mxu0 %v2044_v12 }
 0x147   :  { %v634_v32 = vpop.permute.xlu1 %633 }
 0x148   :  { %1912 = vmatmul.mubr.msk.f32.vlgmr.msra.gmra.mxu0 %vm310_vm2, %v634_v32 }
 0x149   :  { %1921 = vmatprep.mubr.msk.f32.mxu0 %vm2045_vm1, %v2044_v12 }
 0x14b   :  { %v806_v52 = vpop.permute.xlu1 %805 }
 0x14f   :  { %v979_v53 = vpop.permute.xlu1 %978 }
 0x153   :  { %v977_v54 = vpop.permute.xlu1 %976 }
 0x157   :  { %v1150_v56 = vpop.permute.xlu1 %1149 }
 0x15b   :  { %v1148_v58 = vpop.permute.xlu1 %1147 }
 0x15f   :  { %v1320_v60 = vpop.permute.xlu1 %1319 }
 0x163   :  { %v1491_v63 = vpop.permute.xlu1 %1490 }
 0x194   :  { %v383_v39 = vpop.f32.mrf.mxu1 }
 0x195   :  { %v384_v40 = vadd.f32 %v2195_v38, %v383_v39 }
 0x196   :  { %v1893_v41 = vpop.f32.mrf.mxu1 }
 0x197   :  { %v387_v42 = vsel %vm310_vm2, %v384_v40, -inf }
 0x198   :  { %388 = vmax.xlane.f32.xlu0 %v387_v42 }
 0x208   :  { %v707_v43 = vpop.f32.mrf.mxu0 }
 0x209   :  { %v708_v50 = vadd.f32 %v2195_v38, %v707_v43 }
 0x20a   :  { %v1913_v44 = vpop.f32.mrf.mxu0 }
 0x20b   :  { %v711_v51 = vsel %vm310_vm2, %v708_v50, -inf }
 0x221   :  { %v389_v45 = vpop.xlane.xlu0 %388 }
 0x222   :  { %v390_v46 = vsub.f32 %v384_v40, %v389_v45 }
 0x224   :  { %v391_v47 = vmul.f32 1.442695, %v390_v46 }
 0x226   :  { %1990 = vpow2.f32 %v391_v47 }
 0x233   :  { %v1991_v48 = vpop.eup %1990 }
 0x234   :  { %v393_v49 = vsel %vm310_vm2, %v1991_v48, 0.0 }
 0x235   :  { %394 = vadd.xlane.f32.xlu0 %v393_v49 }
 0x24b   :  { %807 = vrot.lane.b32.xlu0 %v2169_v30, %s2046_s2 }
 0x24f   :  { %1317 = vrot.lane.b32.xlu0 %v130_v27, %s2048_s7 }
 0x253   :  { %1488 = vrot.lane.b32.xlu0 %v2163_v29, %s2048_s7 }
 0x272   :  { %712 = vmax.xlane.f32.xlu0 %v711_v51 }
 0x2be   :  { %v395_v55 = vpop.xlane.xlu0 %394 }
 0x2bf   :  { %1992 = vrcp.f32 %v395_v55 }
 0x2c2   :  { %v808_v57 = vpop.permute.xlu0 %807 }
 0x2c3   :  { %1920 = vmatpush3.xpose.msk.msra.mxu0 %vm310_vm2, %v808_v57 }
 0x2c4   :  { %1929 = vmatprep.subr.mxu0 %v2044_v12 }
 0x2c6   :  { %1922 = vmatmul.mubr.msk.f32.vlgmr.msra.gmra.mxu0 %vm310_vm2, %v806_v52  ;;  %v1318_v62 = vpop.permute.xlu0 %1317 }
 0x2c7   :  { %1930 = vmatpush3.xpose.msk.msra.mxu0 %vm310_vm2, %v979_v53  ;;  %1931 = vmatprep.mubr.msk.f32.mxu0 %vm2045_vm1, %v2044_v12 }
 0x2c8   :  { %1939 = vmatprep.subr.mxu0 %v2044_v12 }
 0x2ca   :  { %1932 = vmatmul.mubr.msk.f32.vlgmr.msra.gmra.mxu0 %vm310_vm2, %v977_v54  ;;  %v1489_v0 = vpop.permute.xlu0 %1488 }
 0x2cb   :  { %1940 = vmatpush3.xpose.msk.msra.mxu0 %vm310_vm2, %v1150_v56  ;;  %1941 = vmatprep.mubr.msk.f32.mxu0 %vm2045_vm1, %v2044_v12 }
 0x2cc   :  { %v1993_v59 = vpop.eup %1992  ;;  %1949 = vmatprep.subr.mxu0 %v2044_v12 }
 0x2cd   :  { %v397_v61 = vmul.f32 %v1993_v59, %v1991_v48 }
 0x2ce   :  { %1942 = vmatmul.mubr.msk.f32.vlgmr.msra.gmra.mxu0 %vm310_vm2, %v1148_v58 }
 0x2cf   :  { %1897 = vmatmul.mubr.msk.f32.vlgmr.msra.gmra.mxu1 %vm310_vm2, %v397_v61  ;;  %1950 = vmatpush3.xpose.msk.msra.mxu0 %vm310_vm2, %v1320_v60 }
 0x2d0   :  { %1900 = vmatpush3.xpose.msk.msra.mxu1 %vm310_vm2, %v2169_v30  ;;  %1951 = vmatprep.mubr.msk.f32.mxu0 %vm2045_vm1, %v2044_v12 }
 0x2d1   :  { %1901 = vmatprep.mubr.msk.f32.mxu1 %vm2045_vm1, %v2044_v12  ;;  %1904 = vmatprep.subr.mxu1 %v2044_v12 }
 0x2d2   :  { %1952 = vmatmul.mubr.msk.f32.vlgmr.msra.gmra.mxu0 %vm310_vm2, %v1318_v62  ;;  %1959 = vmatprep.subr.mxu0 %v2044_v12 }
 0x2d3   :  { %1902 = vmatmul.mubr.msk.f32.vlgmr.msra.gmra.mxu1 %vm310_vm2, %v2163_v29  ;;  %1960 = vmatpush3.xpose.msk.msra.mxu0 %vm310_vm2, %v1491_v63 }
 0x2d4   :  { %1905 = vmatpush3.msra.mxu1 %v2186_v35  ;;  %1961 = vmatprep.mubr.msk.f32.mxu0 %vm2045_vm1, %v2044_v12 }
 0x2d5   :  { %1906 = vmatprep.mubr.msk.f32.mxu1 %vm2045_vm1, %v2044_v12  ;;  %1914 = vmatprep.subr.mxu1 %v2044_v12 }
 0x2d6   :  { %1962 = vmatmul.mubr.msk.f32.vlgmr.msra.gmra.mxu0 %vm310_vm2, %v1489_v0 }
 0x2fb   :  { %v713_v1 = vpop.xlane.xlu0 %712 }
 0x2fc   :  { %v714_v2 = vsub.f32 %v708_v50, %v713_v1 }
 0x2fe   :  { %v715_v6 = vmul.f32 1.442695, %v714_v2 }
 0x300   :  { %1994 = vpow2.f32 %v715_v6 }
 0x30d   :  { %v2251_v28 = vpop.eup %1994 }
 0x30e   :  { %v717_v31 = vsel %vm310_vm2, %v2251_v28, 0.0 }
 0x386   :  { %v879_v3 = vpop.f32.mrf.mxu0 }
 0x387   :  { %v880_v4 = vadd.f32 %v2195_v38, %v879_v3 }
 0x388   :  { %v1923_v5 = vpop.f32.mrf.mxu0 }
 0x389   :  { %v883_v7 = vsel %vm310_vm2, %v880_v4, -inf }
 0x38a   :  { %884 = vmax.xlane.f32.xlu0 %v883_v7  ;;  %v1050_v8 = vpop.f32.mrf.mxu0 }
 0x38b   :  { %v1051_v22 = vadd.f32 %v2195_v38, %v1050_v8 }
 0x38c   :  { %v1933_v9 = vpop.f32.mrf.mxu0 }
 0x38d   :  { %v1054_v30 = vsel %vm310_vm2, %v1051_v22, -inf }
 0x38e   :  { %v1221_v10 = vpop.f32.mrf.mxu0 }
 0x38f   :  { %v1222_v11 = vadd.f32 %v2195_v38, %v1221_v10  ;;  %v467_v13 = vpop.f32.mrf.mxu1 }
 0x390   :  { %471 = vst.msk [vmem:[#allocation2] sm:$0xff] %vm310_vm2, %v467_v13  ;;  %v1943_v14 = vpop.f32.mrf.mxu0 }
 0x391   :  { %v1898_v15 = vpop.f32.mrf.mxu1  ;;  %v1225_v16 = vsel %vm310_vm2, %v1222_v11, -inf }
 0x392   :  { %1226 = vmax.xlane.f32.xlu0 %v1225_v16  ;;  %v1391_v17 = vpop.f32.mrf.mxu0 }
 0x393   :  { %v544_v18 = vpop.f32.mrf.mxu1  ;;  %v1392_v29 = vadd.f32 %v2195_v38, %v1391_v17 }
 0x394   :  { %v545_v19 = vadd.f32 %v2195_v38, %v544_v18  ;;  %v1953_v20 = vpop.f32.mrf.mxu0 }
 0x395   :  { %v1903_v21 = vpop.f32.mrf.mxu1  ;;  %v1395_v32 = vsel %vm310_vm2, %v1392_v29, -inf }
 0x396   :  { %v1562_v23 = vpop.f32.mrf.mxu0  ;;  %v548_v24 = vsel %vm310_vm2, %v545_v19, -inf }
 0x397   :  { %v1563_v25 = vadd.f32 %v2195_v38, %v1562_v23  ;;  %549 = vmax.xlane.f32.xlu1 %v548_v24 }
 0x398   :  { %v1963_v26 = vpop.f32.mrf.mxu0 }
 0x399   :  { %v1566_v27 = vsel %vm310_vm2, %v1563_v25, -inf }
 0x39a   :  { %1567 = vmax.xlane.f32.xlu0 %v1566_v27 }
 0x39b   :  { %1055 = vmax.xlane.f32.xlu1 %v1054_v30 }
 0x39e   :  { %718 = vadd.xlane.f32.xlu0 %v717_v31 }
 0x39f   :  { %1396 = vmax.xlane.f32.xlu1 %v1395_v32 }
 0x413   :  { %v885_v33 = vpop.xlane.xlu0 %884 }
 0x414   :  { %v886_v34 = vsub.f32 %v880_v4, %v885_v33 }
 0x416   :  { %v887_v36 = vmul.f32 1.442695, %v886_v34  ;;  %v35_v34 = vld [vmem:[%s2342_s3 + $0x70] sm:$0xff] }
 0x418   :  { %1996 = vpow2.f32 %v887_v36 }
 0x41b   :  { %v1227_v39 = vpop.xlane.xlu0 %1226 }
 0x41c   :  { %v1228_v40 = vsub.f32 %v1222_v11, %v1227_v39  ;;  %v34_v39 = vld [vmem:[%s2342_s3 + $0x68] sm:$0xff] }
 0x41e   :  { %v1229_v41 = vmul.f32 1.442695, %v1228_v40 }
 0x420   :  { %1998 = vpow2.f32 %v1229_v41  ;;  %v550_v38 = vpop.xlane.xlu1 %549  ;;  %v33_v41 = vld [vmem:[%s2342_s3 + $0x60] sm:$0xff] }
 0x421   :  { %v551_v42 = vsub.f32 %v545_v19, %v550_v38 }
 0x423   :  { %v1568_v43 = vpop.xlane.xlu0 %1567  ;;  %v552_v48 = vmul.f32 1.442695, %v551_v42 }
 0x424   :  { %v1569_v44 = vsub.f32 %v1563_v25, %v1568_v43  ;;  %v1056_v45 = vpop.xlane.xlu1 %1055 }
 0x425   :  { %v2258_v46 = vpop.eup %1996  ;;  %v1057_v47 = vsub.f32 %v1051_v22, %v1056_v45 }
 0x426   :  { %v1570_v49 = vmul.f32 1.442695, %v1569_v44  ;;  %v889_v50 = vsel %vm310_vm2, %v2258_v46, 0.0 }
 0x427   :  { %v1058_v51 = vmul.f32 1.442695, %v1057_v47  ;;  %890 = vadd.xlane.f32.xlu1 %v889_v50  ;;  %v719_v4 = vpop.xlane.xlu0 %718 }
 0x428   :  { %2000 = vpow2.f32 %v1570_v49  ;;  %v1397_v52 = vpop.xlane.xlu1 %1396 }
 0x429   :  { %2002 = vpow2.f32 %v1058_v51  ;;  %v1398_v53 = vsub.f32 %v1392_v29, %v1397_v52 }
 0x42a   :  { %2004 = vpow2.f32 %v552_v48 }
 0x42b   :  { %v1399_v54 = vmul.f32 1.442695, %v1398_v53 }
 0x42d   :  { %v2262_v55 = vpop.eup %1998  ;;  %2006 = vpow2.f32 %v1399_v54  ;;  %v1797_v54 = vld [vmem:[%s2343_s4 + $0x3] ss:$0 sm:$0xff] }
 0x42e   :  { %v1231_v56 = vsel %vm310_vm2, %v2262_v55, 0.0 }
 0x42f   :  { %1232 = vadd.xlane.f32.xlu1 %v1231_v56 }
 0x435   :  { %v2266_v57 = vpop.eup %2000 }
 0x436   :  { %v2003_v58 = vpop.eup %2002  ;;  %v1572_v59 = vsel %vm310_vm2, %v2266_v57, 0.0 }
 0x437   :  { %v2005_v60 = vpop.eup %2004  ;;  %1573 = vadd.xlane.f32.xlu1 %v1572_v59  ;;  %v1060_v61 = vsel %vm310_vm2, %v2003_v58, 0.0 }
 0x438   :  { %1061 = vadd.xlane.f32.xlu0 %v1060_v61  ;;  %v554_v63 = vsel %vm310_vm2, %v2005_v60, 0.0 }
 0x43a   :  { %v2007_v62 = vpop.eup %2006 }
 0x43b   :  { %555 = vadd.xlane.f32.xlu1 %v554_v63  ;;  %v1401_v0 = vsel %vm310_vm2, %v2007_v62, 0.0 }
 0x43c   :  { %1402 = vadd.xlane.f32.xlu0 %v1401_v0 }
 0x44c   :  { %895 = vrot.lane.b32.xlu1 %v2186_v35, %s2046_s2 }
 0x450   :  { %1065 = vrot.lane.b32.xlu1 %v2188_v37, %s2047_s6 }
 0x452   :  { %723 = vrot.lane.b32.xlu0 %v2188_v37, %s2046_s2 }
 0x454   :  { %1406 = vrot.lane.b32.xlu1 %v2188_v37, %s2048_s7 }
 0x456   :  { %1236 = vrot.lane.b32.xlu0 %v2186_v35, %s2047_s6 }
 0x45a   :  { %1577 = vrot.lane.b32.xlu0 %v2186_v35, %s2048_s7 }
 0x4b0   :  { %v891_v1 = vpop.xlane.xlu1 %890 }
 0x4b8   :  { %v1233_v2 = vpop.xlane.xlu1 %1232 }
 0x4c0   :  { %v1574_v3 = vpop.xlane.xlu1 %1573 }
 0x4c1   :  { %v1062_v6 = vpop.xlane.xlu0 %1061 }
 0x4c4   :  { %v556_v5 = vpop.xlane.xlu1 %555 }
 0x4c5   :  { %2008 = vrcp.f32 %v556_v5  ;;  %v1403_v7 = vpop.xlane.xlu0 %1402 }
 0x4c6   :  { %2010 = vrcp.f32 %v719_v4 }
 0x4c7   :  { %2012 = vrcp.f32 %v891_v1 }
 0x4c8   :  { %2014 = vrcp.f32 %v1062_v6  ;;  %v896_v35 = vpop.permute.xlu1 %895 }
 0x4c9   :  { %2016 = vrcp.f32 %v1233_v2  ;;  %v724_v10 = vpop.permute.xlu0 %723 }
 0x4ca   :  { %2018 = vrcp.f32 %v1403_v7 }
 0x4cb   :  { %2020 = vrcp.f32 %v1574_v3 }
 0x4cc   :  { %v1066_v16 = vpop.permute.xlu1 %1065 }
 0x4cd   :  { %v1237_v19 = vpop.permute.xlu0 %1236 }
 0x4d0   :  { %v1407_v22 = vpop.permute.xlu1 %1406 }
 0x4d1   :  { %v1578_v25 = vpop.permute.xlu0 %1577 }
 0x4d2   :  { %v2009_v8 = vpop.eup %2008 }
 0x4d3   :  { %v558_v37 = vmul.f32 %v2009_v8, %v2005_v60  ;;  %v2011_v9 = vpop.eup %2010 }
 0x4d4   :  { %v721_v11 = vmul.f32 %v2011_v9, %v2251_v28  ;;  %v2013_v13 = vpop.eup %2012 }
 0x4d5   :  { %1907 = vmatmul.mubr.msk.f32.vlgmr.msra.gmra.mxu1 %vm310_vm2, %v558_v37  ;;  %v893_v14 = vmul.f32 %v2013_v13, %v2258_v46  ;;  %v2015_v15 = vpop.eup %2014 }
 0x4d6   :  { %1915 = vmatpush3.msra.mxu1 %v724_v10  ;;  %1916 = vmatprep.mubr.msk.f32.mxu1 %vm2045_vm1, %v2044_v12  ;;  %v1064_v17 = vmul.f32 %v2015_v15, %v2003_v58  ;;  %v2017_v18 = vpop.eup %2016 }
 0x4d7   :  { %1924 = vmatprep.subr.mxu1 %v2044_v12  ;;  %v1235_v20 = vmul.f32 %v2017_v18, %v2262_v55  ;;  %v2019_v21 = vpop.eup %2018 }
 0x4d8   :  { %v1405_v23 = vmul.f32 %v2019_v21, %v2007_v62  ;;  %v2021_v24 = vpop.eup %2020 }
 0x4d9   :  { %1917 = vmatmul.mubr.msk.f32.vlgmr.msra.gmra.mxu1 %vm310_vm2, %v721_v11  ;;  %v1576_v26 = vmul.f32 %v2021_v24, %v2266_v57 }
 0x4da   :  { %1925 = vmatpush3.msra.mxu1 %v896_v35  ;;  %1926 = vmatprep.mubr.msk.f32.mxu1 %vm2045_vm1, %v2044_v12 }
 0x4db   :  { %1934 = vmatprep.subr.mxu1 %v2044_v12 }
 0x4dd   :  { %1927 = vmatmul.mubr.msk.f32.vlgmr.msra.gmra.mxu1 %vm310_vm2, %v893_v14 }
 0x4de   :  { %1935 = vmatpush3.msra.mxu1 %v1066_v16  ;;  %1936 = vmatprep.mubr.msk.f32.mxu1 %vm2045_vm1, %v2044_v12 }
 0x4df   :  { %1944 = vmatprep.subr.mxu1 %v2044_v12 }
 0x4e1   :  { %1937 = vmatmul.mubr.msk.f32.vlgmr.msra.gmra.mxu1 %vm310_vm2, %v1064_v17 }
 0x4e2   :  { %1945 = vmatpush3.msra.mxu1 %v1237_v19  ;;  %1946 = vmatprep.mubr.msk.f32.mxu1 %vm2045_vm1, %v2044_v12 }
 0x4e3   :  { %1954 = vmatprep.subr.mxu1 %v2044_v12 }
 0x4e5   :  { %1947 = vmatmul.mubr.msk.f32.vlgmr.msra.gmra.mxu1 %vm310_vm2, %v1235_v20 }
 0x4e6   :  { %1955 = vmatpush3.msra.mxu1 %v1407_v22  ;;  %1956 = vmatprep.mubr.msk.f32.mxu1 %vm2045_vm1, %v2044_v12 }
 0x4e7   :  { %1964 = vmatprep.subr.mxu1 %v2044_v12 }
 0x4e9   :  { %1957 = vmatmul.mubr.msk.f32.vlgmr.msra.gmra.mxu1 %vm310_vm2, %v1405_v23 }
 0x4ea   :  { %1965 = vmatpush3.msra.mxu1 %v1578_v25  ;;  %1966 = vmatprep.mubr.msk.f32.mxu1 %vm2045_vm1, %v2044_v12  ;;  %v36_v12 = vld [vmem:[%s2342_s3 + $0x78] sm:$0xff] }
 0x4eb   :  { %1969 = vmatprep.subr.mxu0 %v36_v12 }
 0x4ec   :  { %1970 = vmatpush3.msra.mxu0 %v36_v12 }
 0x4ed   :  { %1967 = vmatmul.mubr.msk.f32.vlgmr.msra.gmra.mxu1 %vm310_vm2, %v1576_v26  ;;  %1971 = vmatprep.subr.mxu0 %v35_v34 }
 0x4ee   :  { %1972 = vmatpush3.msra.mxu0 %v35_v34 }
 0x4ef   :  { %1973 = vmatprep.subr.mxu0 %v34_v39 }
 0x4f0   :  { %1974 = vmatpush3.msra.mxu0 %v34_v39 }
 0x4f1   :  { %1975 = vmatprep.subr.mxu0 %v33_v41 }
 0x4f2   :  { %1976 = vmatpush3.msra.mxu0 %v33_v41 }
 0x595   :  { %v628_v27 = vpop.f32.mrf.mxu1 }
 0x596   :  { %632 = vst.msk [vmem:[#allocation2 + $0x8] sm:$0xff] %vm310_vm2, %v628_v27 }
 0x597   :  { %v1908_v28 = vpop.f32.mrf.mxu1 }
 0x599   :  { %v795_v29 = vpop.f32.mrf.mxu1 }
 0x59a   :  { %800 = vrot.lane.b32.xlu1 %v795_v29, %s2049_s12 }
 0x59b   :  { %v1918_v30 = vpop.f32.mrf.mxu1 }
 0x59d   :  { %v967_v31 = vpop.f32.mrf.mxu1 }
 0x59e   :  { %972 = vrot.lane.b32.xlu0 %v967_v31, %s2049_s12 }
 0x59f   :  { %v1928_v32 = vpop.f32.mrf.mxu1 }
 0x5a1   :  { %v1137_v33 = vpop.f32.mrf.mxu1 }
 0x5a2   :  { %1142 = vrot.lane.b32.xlu1 %v1137_v33, %s2050_s0 }
 0x5a3   :  { %v1938_v36 = vpop.f32.mrf.mxu1 }
 0x5a5   :  { %v1308_v40 = vpop.f32.mrf.mxu1 }
 0x5a6   :  { %1313 = vrot.lane.b32.xlu0 %v1308_v40, %s2050_s0 }
 0x5a7   :  { %v1948_v38 = vpop.f32.mrf.mxu1 }
 0x5a9   :  { %v1478_v42 = vpop.f32.mrf.mxu1 }
 0x5aa   :  { %1483 = vrot.lane.b32.xlu1 %v1478_v42, %s2051_s20 }
 0x5ab   :  { %v1958_v43 = vpop.f32.mrf.mxu1 }
 0x5ad   :  { %v1649_v44 = vpop.f32.mrf.mxu1 }
 0x5ae   :  { %1654 = vrot.lane.b32.xlu0 %v1649_v44, %s2051_s20 }
 0x5af   :  { %v1968_v45 = vpop.f32.mrf.mxu1 }
 0x60c   :  { %v801_v46 = vpop.permute.xlu1 %800 }
 0x60d   :  { %804 = vst.msk [vmem:[#allocation2] sm:$0xff] %vm803_vm3, %v801_v46 }
 0x610   :  { %v973_v47 = vpop.permute.xlu0 %972 }
 0x611   :  { %975 = vst.msk [vmem:[#allocation2 + $0x8] sm:$0xff] %vm803_vm3, %v973_v47 }
 0x614   :  { %v1143_v48 = vpop.permute.xlu1 %1142 }
 0x615   :  { %1146 = vst.msk [vmem:[#allocation2] sm:$0xff] %vm1145_vm4, %v1143_v48 }
 0x618   :  { %v1314_v49 = vpop.permute.xlu0 %1313 }
 0x619   :  { %1316 = vst.msk [vmem:[#allocation2 + $0x8] sm:$0xff] %vm1145_vm4, %v1314_v49 }
 0x61c   :  { %v1484_v50 = vpop.permute.xlu1 %1483 }
 0x61d   :  { %1487 = vst.msk [vmem:[#allocation2] sm:$0xff] %vm1486_vm5, %v1484_v50 }
 0x620   :  { %v1655_v51 = vpop.permute.xlu0 %1654 }
 0x621   :  { %1657 = vst.msk [vmem:[#allocation2 + $0x8] sm:$0xff] %vm1486_vm5, %v1655_v51 }
 0x624   :  { %v1658_v52 = vld [vmem:[#allocation2] sm:$0xff] }
 0x625   :  { %1977 = vmatprep.mubr.msk.f32.mxu0 %vm48_vm0, %v1658_v52 }
 0x628   :  { %v1659_v53 = vld [vmem:[#allocation2 + $0x8] sm:$0xff] }
 0x629   :  { %1978 = vmatmul.mubr.msk.f32.vlgmr.msra.gmra.mxu0 %vm48_vm0, %v1659_v53 }
 0x6e9   :  { %v1979_v55 = vpop.f32.mrf.mxu0 }
 0x6ea   :  { %v1742_v56 = vadd.f32 %v1979_v55, %v1797_v54 }
 0x6eb   :  { %v1736_v57 = vpop.f32.mrf.mxu0 }
 0x6ec   :  { %1746 = vst.msk [vmem:[#allocation3 + $0x8] sm:$0xff] %vm48_vm0, %v1742_v56  ;;  %v1737_v58 = vadd.f32 %v1797_v54, %v1736_v57 }
 0x6ee   :  { %1745 = vst.msk [vmem:[#allocation3] sm:$0xff] %vm48_vm0, %v1737_v58 }
 0x6ef   :  { %2033 = shalt.err (!%p2030_p4)
}
 0x6f0   :  { %s2053_s25 = smov 128  }
 0x6f1   :  { %1758 = dma.vmem_to_hbm [thread:$0]  %s1753_s23, 256, %s2344_s5, [#allocation4], %s2053_s25, %s2053_s25, %s2049_s12  }
 0x6f2   :  { %2042 = dma.done.wait [#allocation4], 256  }
 0x6f3   :  { %2043 = vsyncadd [#allocation4], 4294967040 }
 0x6f4   :  { %1762 = vsyncpa [#allocation4], 1 }

</bundles_post_ra>
